<compile_context>
chip_gen: v6e
topology: v6e:2x2x1
jax: 0.10.0
libtpu: 0.0.40
codegen_flags: <defaults>
</compile_context>

<pallas_src>
import functools
import math

import jax
import jax.numpy as jnp
from jax.experimental import pallas as pl
from jax.experimental.pallas import tpu as pltpu


_TARGET_BLOCK_BYTES = 2 * 1024 * 1024   # ~2 MiB blocks: past the pipeline knee
_VMEM_LIMIT_BYTES = 32 * 1024 * 1024    # conservative for v7x's 64 MiB VMEM
_MIN_GRID_BLOCKS = 4                    # let ("parallel",) shard across 2 TCs (v7x)

# int32 bit patterns of the lowbias32 hash constants (wrapping int32 math ==
# uint32 math; logical shifts emulated with arithmetic shift + mask).
_HASH_M1 = 0x7FEB352D        # 2146121005
_HASH_M2 = -2073368949       # int32 view of 0x846CA68B
_GOLDEN = -1640531527        # int32 view of 0x9E3779B9


def _round_up(x, m):
    return ((x + m - 1) // m) * m


def _srl(x, n):
    """Logical right shift of int32 by a static amount n."""
    mask = (1 << (32 - n)) - 1
    return (x >> n) & mask


def _hash_i32(x):
    """lowbias32-style integer hash on int32 (wraps like uint32)."""
    x = x ^ _srl(x, 16)
    x = x * jnp.int32(_HASH_M1)
    x = x ^ _srl(x, 15)
    x = x * jnp.int32(_HASH_M2)
    x = x ^ _srl(x, 16)
    return x


def _uniform_from_index(seed_i32, idx_i32):
    """Deterministic Uniform[0, 1) from (seed, flat element index)."""
    bits = _hash_i32(idx_i32 + seed_i32 * jnp.int32(_GOLDEN))
    mant = _srl(bits, 9)                               # top 23 bits -> [0, 2^23)
    return mant.astype(jnp.float32) * jnp.float32(1.0 / (1 << 23))


def _gumbel_noise(u, eps):
    eps_f = jnp.float32(eps)
    return -jnp.log(-jnp.log(u + eps_f) + eps_f)


def _pick_row_tile(rows, vp, itemsize):
    """Rows per block: ~2 MiB, multiple of 8, and split so the grid has at
    least _MIN_GRID_BLOCKS steps (megacore sharding on v7x)."""
    rows8 = _round_up(max(rows, 1), 8)
    tile = max(8, (_TARGET_BLOCK_BYTES // (itemsize * vp)) // 8 * 8)
    split_cap = max(8, _round_up(-(-rows8 // _MIN_GRID_BLOCKS), 8))
    tile = min(tile, split_cap)
    return min(tile, rows8)


def _gumbel_softmax_kernel(seed_ref, logits_ref, out_ref, *, inv_temp, eps,
                           row_tile, vp):
    # Per-element flat index -> in-kernel Gumbel noise (no HBM round-trip).
    row0 = pl.program_id(0) * row_tile
    rows = jax.lax.broadcasted_iota(jnp.int32, (row_tile, vp), 0)
    cols = jax.lax.broadcasted_iota(jnp.int32, (row_tile, vp), 1)
    idx = (row0 + rows) * vp + cols
    u = _uniform_from_index(seed_ref[0], idx)
    noise = _gumbel_noise(u, eps)               # f32: keep the Gumbel tail exact

    y = (logits_ref[...].astype(jnp.float32) + noise) * inv_temp
    m = jnp.max(y, axis=-1, keepdims=True)
    e = jnp.exp(y - m)
    denom = jnp.sum(e, axis=-1, keepdims=True)
    # Exact per-row reciprocal (only `row_tile` divides) + lane-dense broadcast
    # multiply, so probabilities sum to 1 at f32 accuracy.
    out_ref[...] = (e * (jnp.float32(1.0) / denom)).astype(out_ref.dtype)
    # TODO(synk): on v7x (compute-bound after bf16 I/O) consider a bf16 exp /
    # exponential-race form to trim EUP work; kept f32 for accuracy here.


def gumbel_softmax(logits, seed, temperature=1.0, eps=1e-10, row_tile=None,
                   vmem_limit_bytes=_VMEM_LIMIT_BYTES):
    """Gumbel-Softmax over the last axis; noise generated in-kernel."""
    orig_shape = logits.shape
    v = orig_shape[-1]
    rows = int(math.prod(orig_shape[:-1]))
    vp = _round_up(v, 128)
    itemsize = jnp.dtype(logits.dtype).itemsize

    logits2d = logits.reshape(rows, v)
    if vp != v:
        # Lane-dense stores: pad vocab to a multiple of 128 with -inf (exactly
        # zero contribution to the softmax), slice the output afterwards.
        logits2d = jnp.pad(logits2d, ((0, 0), (0, vp - v)),
                           constant_values=-jnp.inf)

    if row_tile is None:
        row_tile = _pick_row_tile(rows, vp, itemsize)
    inv_temp = 1.0 / float(temperature)
    seed_arr = jnp.asarray([seed], dtype=jnp.int32)

    kernel = functools.partial(_gumbel_softmax_kernel, inv_temp=inv_temp,
                               eps=float(eps), row_tile=row_tile, vp=vp)

    out = pl.pallas_call(
        kernel,
        out_shape=jax.ShapeDtypeStruct((rows, vp), logits.dtype),
        grid_spec=pltpu.PrefetchScalarGridSpec(
            num_scalar_prefetch=1,
            grid=(pl.cdiv(rows, row_tile),),
            in_specs=[pl.BlockSpec((row_tile, vp), lambda i, seed_ref: (i, 0))],
            out_specs=pl.BlockSpec((row_tile, vp), lambda i, seed_ref: (i, 0)),
        ),
        compiler_params=pltpu.CompilerParams(
            dimension_semantics=("parallel",),
            vmem_limit_bytes=vmem_limit_bytes,
        ),
    )(seed_arr, logits2d)

    if vp != v:
        out = out[:, :v]
    return out.reshape(orig_shape)


def gumbel_softmax_reference(logits, seed, temperature=1.0, eps=1e-10):
    """Plain-JAX reference reproducing the kernel's noise stream exactly."""
    orig_shape = logits.shape
    v = orig_shape[-1]
    rows = int(math.prod(orig_shape[:-1]))
    vp = _round_up(v, 128)
    ridx = jnp.arange(rows, dtype=jnp.int32)[:, None]
    cidx = jnp.arange(v, dtype=jnp.int32)[None, :]
    idx = ridx * vp + cidx
    u = _uniform_from_index(jnp.int32(seed), idx)
    noise = _gumbel_noise(u, eps)
    y = (logits.reshape(rows, v).astype(jnp.float32) + noise) / temperature
    return jax.nn.softmax(y, axis=-1).reshape(orig_shape)


if __name__ == "__main__":
    key = jax.random.PRNGKey(0)
    k1, k2 = jax.random.split(key)

    # --- V == 128 (lane-dense), rows = 2*8 = 16, f32 I/O -------------------
    B, S, V = 2, 8, 128
    logits = jax.random.normal(k1, (B, S, V), dtype=jnp.float32)

    out = jax.block_until_ready(gumbel_softmax(logits, seed=1234, temperature=0.8))
    assert out.shape == logits.shape and out.dtype == logits.dtype
    ref = gumbel_softmax_reference(logits, seed=1234, temperature=0.8)
    assert bool(jnp.allclose(out, ref, atol=1e-3, rtol=1e-3))
    assert bool(jnp.all(out >= 0.0)) and bool(jnp.all(jnp.isfinite(out)))
    assert bool(jnp.allclose(jnp.sum(out, axis=-1), 1.0, atol=1e-3))
    # Deterministic given the seed; different seed gives different noise.
    out_again = jax.block_until_ready(gumbel_softmax(logits, seed=1234, temperature=0.8))
    assert bool(jnp.array_equal(out, out_again))
    out_other = jax.block_until_ready(gumbel_softmax(logits, seed=4321, temperature=0.8))
    assert not bool(jnp.array_equal(out, out_other))

    # --- bf16 I/O path (halves HBM bytes; in-kernel math stays f32) --------
    logits_bf16 = logits.astype(jnp.bfloat16)
    out_bf16 = jax.block_until_ready(
        gumbel_softmax(logits_bf16, seed=1234, temperature=0.8))
    assert out_bf16.dtype == jnp.bfloat16 and out_bf16.shape == logits.shape
    ref_bf16 = gumbel_softmax_reference(logits_bf16.astype(jnp.float32),
                                        seed=1234, temperature=0.8)
    assert bool(jnp.allclose(out_bf16.astype(jnp.float32), ref_bf16,
                             atol=2e-2, rtol=2e-2))
    assert bool(jnp.allclose(jnp.sum(out_bf16.astype(jnp.float32), axis=-1),
                             1.0, atol=2e-2))

    # --- ragged rows + V not a multiple of 128 (padded with -inf) ----------
    B2, S2, V2 = 5, 8, 100   # 40 rows -> row_tile 16 -> 3 blocks, ragged tail
    logits2 = jax.random.normal(k2, (B2, S2, V2), dtype=jnp.float32)
    out2 = jax.block_until_ready(gumbel_softmax(logits2, seed=7, temperature=0.5))
    ref2 = gumbel_softmax_reference(logits2, seed=7, temperature=0.5)
    assert out2.shape == logits2.shape
    assert bool(jnp.allclose(out2, ref2, atol=1e-3, rtol=1e-3))
    assert bool(jnp.allclose(jnp.sum(out2, axis=-1), 1.0, atol=1e-3))

    print("KERNEL_OK")
</pallas_src>

<mosaic_0001>
module attributes {stable_mosaic.version = 11 : i64} {
  func.func @_gumbel_softmax_kernel(%arg0: i32, %arg1: memref<1xi32, #tpu.memory_space<smem>>, %arg2: memref<8x128xf32, #tpu.memory_space<vmem>>, %arg3: memref<8x128xf32, #tpu.memory_space<vmem>>) attributes {dimension_semantics = [#tpu.dimension_semantics<parallel>], iteration_bounds = array<i64: 2>, scalar_prefetch = 1 : i64, scratch_operands = 0 : i64, tpu.core_type = #tpu.core_type<tc>, window_params = [{transform_indices = @transform_0, window_bounds = array<i64: 8, 128>}, {transform_indices = @transform_1, window_bounds = array<i64: 8, 128>}]} {
    %c8_i32 = arith.constant 8 : i32
    %0 = arith.muli %arg0, %c8_i32 : i32
    %1 = tpu.iota {dimensions = array<i32: 0>} : vector<8x128xi32>
    %2 = tpu.iota {dimensions = array<i32: 1>} : vector<8x128xi32>
    %3 = vector.broadcast %0 : i32 to vector<8x128xi32>
    %4 = arith.addi %3, %1 : vector<8x128xi32>
    %c128_i32 = arith.constant 128 : i32
    %5 = vector.broadcast %c128_i32 : i32 to vector<8x128xi32>
    %6 = arith.muli %4, %5 : vector<8x128xi32>
    %7 = arith.addi %6, %2 : vector<8x128xi32>
    %c0 = arith.constant 0 : index
    %8 = memref.load %arg1[%c0] : memref<1xi32, #tpu.memory_space<smem>>
    %c-1640531527_i32 = arith.constant -1640531527 : i32
    %9 = arith.muli %8, %c-1640531527_i32 : i32
    %10 = vector.broadcast %9 : i32 to vector<8x128xi32>
    %11 = arith.addi %7, %10 : vector<8x128xi32>
    %c16_i32 = arith.constant 16 : i32
    %12 = vector.broadcast %c16_i32 : i32 to vector<8x128xi32>
    %13 = arith.shrsi %11, %12 : vector<8x128xi32>
    %c65535_i32 = arith.constant 65535 : i32
    %14 = vector.broadcast %c65535_i32 : i32 to vector<8x128xi32>
    %15 = arith.andi %13, %14 : vector<8x128xi32>
    %16 = arith.xori %11, %15 : vector<8x128xi32>
    %c2146121005_i32 = arith.constant 2146121005 : i32
    %17 = vector.broadcast %c2146121005_i32 : i32 to vector<8x128xi32>
    %18 = arith.muli %16, %17 : vector<8x128xi32>
    %c15_i32 = arith.constant 15 : i32
    %19 = vector.broadcast %c15_i32 : i32 to vector<8x128xi32>
    %20 = arith.shrsi %18, %19 : vector<8x128xi32>
    %c131071_i32 = arith.constant 131071 : i32
    %21 = vector.broadcast %c131071_i32 : i32 to vector<8x128xi32>
    %22 = arith.andi %20, %21 : vector<8x128xi32>
    %23 = arith.xori %18, %22 : vector<8x128xi32>
    %c-2073368949_i32 = arith.constant -2073368949 : i32
    %24 = vector.broadcast %c-2073368949_i32 : i32 to vector<8x128xi32>
    %25 = arith.muli %23, %24 : vector<8x128xi32>
    %c16_i32_0 = arith.constant 16 : i32
    %26 = vector.broadcast %c16_i32_0 : i32 to vector<8x128xi32>
    %27 = arith.shrsi %25, %26 : vector<8x128xi32>
    %c65535_i32_1 = arith.constant 65535 : i32
    %28 = vector.broadcast %c65535_i32_1 : i32 to vector<8x128xi32>
    %29 = arith.andi %27, %28 : vector<8x128xi32>
    %30 = arith.xori %25, %29 : vector<8x128xi32>
    %c9_i32 = arith.constant 9 : i32
    %31 = vector.broadcast %c9_i32 : i32 to vector<8x128xi32>
    %32 = arith.shrsi %30, %31 : vector<8x128xi32>
    %c8388607_i32 = arith.constant 8388607 : i32
    %33 = vector.broadcast %c8388607_i32 : i32 to vector<8x128xi32>
    %34 = arith.andi %32, %33 : vector<8x128xi32>
    %35 = arith.sitofp %34 : vector<8x128xi32> to vector<8x128xf32>
    %cst = arith.constant 1.1920929E-7 : f32
    %36 = vector.broadcast %cst : f32 to vector<8x128xf32>
    %37 = arith.mulf %35, %36 : vector<8x128xf32>
    %cst_2 = arith.constant 1.000000e-10 : f32
    %38 = vector.broadcast %cst_2 : f32 to vector<8x128xf32>
    %39 = arith.addf %37, %38 : vector<8x128xf32>
    %40 = math.log %39 : vector<8x128xf32>
    %cst_3 = arith.constant 0.000000e+00 : f32
    %41 = vector.broadcast %cst_3 : f32 to vector<8x128xf32>
    %42 = arith.subf %41, %40 : vector<8x128xf32>
    %cst_4 = arith.constant 1.000000e-10 : f32
    %43 = vector.broadcast %cst_4 : f32 to vector<8x128xf32>
    %44 = arith.addf %42, %43 : vector<8x128xf32>
    %45 = math.log %44 : vector<8x128xf32>
    %cst_5 = arith.constant 0.000000e+00 : f32
    %46 = vector.broadcast %cst_5 : f32 to vector<8x128xf32>
    %47 = arith.subf %46, %45 : vector<8x128xf32>
    %c0_6 = arith.constant 0 : index
    %c0_7 = arith.constant 0 : index
    %48 = vector.load %arg2[%c0_6, %c0_7] : memref<8x128xf32, #tpu.memory_space<vmem>>, vector<8x128xf32>
    %49 = arith.addf %48, %47 : vector<8x128xf32>
    %cst_8 = arith.constant 1.250000e+00 : f32
    %50 = vector.broadcast %cst_8 : f32 to vector<8x128xf32>
    %51 = arith.mulf %49, %50 : vector<8x128xf32>
    %cst_9 = arith.constant dense<0xFF800000> : vector<8xf32>
    %52 = vector.multi_reduction <maximumf>, %51, %cst_9 [1] : vector<8x128xf32> to vector<8xf32>
    %53 = vector.shape_cast %52 : vector<8xf32> to vector<8x1xf32>
    %54 = vector.broadcast %53 : vector<8x1xf32> to vector<8x128xf32>
    %55 = arith.subf %51, %54 : vector<8x128xf32>
    %56 = math.exp %55 : vector<8x128xf32>
    %cst_10 = arith.constant dense<0.000000e+00> : vector<8xf32>
    %57 = vector.multi_reduction <add>, %56, %cst_10 [1] : vector<8x128xf32> to vector<8xf32>
    %58 = vector.shape_cast %57 : vector<8xf32> to vector<8x1xf32>
    %cst_11 = arith.constant 1.000000e+00 : f32
    %59 = vector.broadcast %cst_11 : f32 to vector<8x1xf32>
    %60 = arith.divf %59, %58 : vector<8x1xf32>
    %61 = vector.broadcast %60 : vector<8x1xf32> to vector<8x128xf32>
    %62 = arith.mulf %56, %61 : vector<8x128xf32>
    %c0_12 = arith.constant 0 : index
    %c0_13 = arith.constant 0 : index
    %63 = vector.load %arg3[%c0_12, %c0_13] : memref<8x128xf32, #tpu.memory_space<vmem>>, vector<8x128xf32>
    tpu.vector_store %arg3[%c0_12, %c0_13], %62 {strides = array<i32>} : memref<8x128xf32, #tpu.memory_space<vmem>>, vector<8x128xf32>,
    return
  }
  func.func @transform_0(%arg0: i32, %arg1: memref<1xi32, #tpu.memory_space<smem>>) -> (i32, i32) {
    %c0_i32 = arith.constant 0 : i32
    %c0_i32_0 = arith.constant 0 : i32
    return %arg0, %c0_i32 : i32, i32
  }
  func.func @transform_1(%arg0: i32, %arg1: memref<1xi32, #tpu.memory_space<smem>>) -> (i32, i32) {
    %c0_i32 = arith.constant 0 : i32
    %c0_i32_0 = arith.constant 0 : i32
    return %arg0, %c0_i32 : i32, i32
  }
}

</mosaic_0001>

<bundles_post_ra>
// kernel: tpu_custom_call.1
= control target key start
LH: loop header
LB: loop body
LE: loop exit
PB: predicated region body
PF: predicated region fallthrough
CT: control target
= control target key end

     0   :  { %s602_s0 = inlined_call_operand.<no memory space> [shape: s32[1], index: 0, kind: input, shape index: {}]   ;;  %s603_s1 = inlined_call_operand.hbm [shape: f32[16,128], index: 1, kind: input, shape index: {}]   ;;  %s604_s2 = inlined_call_operand.hbm [shape: f32[16,128], index: 2, kind: output, shape index: {}]  }
   0x1   :  { %7 = sst [smem:[#allocation3]] %s602_s0 }
   0x2   :  { %8 = vsyncpa [#allocation5], 0 }
   0x3   :  { %10 = vsyncpa [#allocation5 + $0x1], 0 }
   0x4   :  { %11 = vsyncpa [#allocation6], 0 }
   0x5   :  { %13 = vsyncpa [#allocation6 + $0x1], 0  ;;  %s453_s11 = smov 0   ;;  %s455_s12 = smov 0  }
   0x6   :  { %s457_s13 = smov 0   ;;  %s459_s14 = smov 0  }
   0x7 LB: > { %s474_s0 = sadd.s32 4294967295, %s431_s14   ;;  %s268_s15 = sadd.s32 4294967294, %s431_s14   ;;  %s431_s14 = sphi %s459_s14, %s621_s14   ;;  %s427_s13 = sphi %s457_s13, %s620_s13   ;;  %s423_s12 = sphi %s455_s12, %s619_s12   ;;  %s419_s11 = sphi %s453_s11, %s618_s11  }
   0x8   : > { %s478_s16 = sadd.s32 1, %s431_s14   ;;  %s26_s17 = sadd.s32 1, %s427_s13 }
   0x9   : > { %s23_s18 = ssub.s32 %s431_s14, %s478_s16  ;;  %p33_p0 = scmp.ne.s32.totalorder %s427_s13, %s423_s12 }
   0xa   : > { %p24_p1 = scmp.eq.s32.totalorder %s23_s18, 0  ;;  %p34_p2 = scmp.eq.s32.totalorder %s431_s14, 0 }
   0xb   : > { %p39_p3 = scmp.ne.s32.totalorder %s423_s12, %s419_s11  ;;  %p40_p4 = scmp.eq.s32.totalorder %s474_s0, 0 }
   0xc   : > { %s490_s19 = scalar_select %p24_p1, %s427_s13, %s26_s17  }
   0xd   : > { %p492_p5 = por %p34_p2, %p33_p0  ;;  %p496_p6 = por %p40_p4, %p39_p3 }
   0xe   : > { %p63_p7 = scmp.eq.s32.totalorder %s474_s0, 1  ;;  %p69_p8 = scmp.eq.s32.totalorder %s268_s15, 1 }
   0xf   : > { %s608_s21 = scalar_select %p496_p6, 1, 0 }
  0x10   : > { %p297_p10 = scmp.lt.s32.totalorder %s431_s14, 2  ;;  %p503_p11 = por %p63_p7, %p33_p0 }
  0x11   : > { %p507_p12 = por %p69_p8, %p39_p3  ;;  %s89_s24 = sand.u32 1, %s427_s13  }
  0x12   : > { %s609_s22 = scalar_select %p503_p11, 1, 0 }
  0x13   : > { %s610_s23 = scalar_select %p507_p12, 1, 0 }
  0x14   : > { %s272_s25 = sshll.u32 %s431_s14, 7  ;;  %s271_s26 = sshll.u32 %s89_s24, 3 }
  0x15   : > { %s516_s29 = scalar_lea.hbm %s603_s1, %s272_s25  ;;  %s93_s30 = scalar_lea.vmem [#allocation4], %s271_s26 }
  0x16   : > { %s100_s3 = sshll.u32 %s93_s30, 4  ;;  %p520_p13 = pnand %p297_p10, %p492_p5  ;;  %s524_s3 = int_to_ptr.vmem [resolvable:$true] %s100_s3 }
  0x17   : > { %s90_s5 = scalar_lea.sflag [#allocation5], %s89_s24  ;;  %s339_s6 = scalar_lea.hbm %s516_s29, 128 }
  0x18   : > { %p340_p2 = scmp.ne.s32.totalorder %s516_s29, %s339_s6  ;;  %p341_p3 = pneg %p520_p13 }
  0x19   : > { %s344_s9 = scalar_lea.hbm %s603_s1, 256  ;;  %p345_p5 = scmp.lt.s32.totalorder %s516_s29, %s603_s1 }
  0x1a   : > { %p342_p4 = pnand %p341_p3, %p340_p2  ;;  %p346_p8 = scmp.lt.s32.totalorder %s344_s9, %s339_s6 }
  0x1c   : > { %p343_p7 = pneg %p342_p4  ;;  %p347_p10 = por %p346_p8, %p345_p5 }
  0x1e   : > { %p348_p9 = pnand %p347_p10, %p343_p7 }
  0x20   : > { %351 = shalt.err (!%p348_p9)
}
  0x21   : > { %s352_s17 = scalar_lea.vmem %s524_s3, 128  ;;  %s433_s18 = smov [#allocation4]  }
  0x22   : > { %p353_p0 = scmp.ne.s32.totalorder %s524_s3, %s352_s17  ;;  %s357_s20 = sshll.u32 %s433_s18, 4  ;;  %s358_s20 = int_to_ptr.vmem [resolvable:$false] %s357_s20 }
  0x23   : > { %s359_s24 = scalar_lea.vmem %s358_s20, 256  ;;  %p360_p4 = scmp.lt.s32.totalorder %s524_s3, %s358_s20 }
  0x24   : > { %p355_p1 = pnand %p353_p0, %p341_p3  ;;  %p361_p12 = scmp.lt.s32.totalorder %s359_s24, %s352_s17 }
  0x26   : > { %p356_p2 = pneg %p355_p1  ;;  %p362_p11 = por %p361_p12, %p360_p4 }
  0x28   : > { %p363_p6 = pnand %p362_p11, %p356_p2 }
  0x2a   : > { %366 = shalt.err (!%p363_p6)
}
  0x2b   : > { %292 = dma.hbm_to_vmem [thread:$0]  (!%p520_p13), %s516_s29, 128, %s524_s3, %s90_s5  }
  0x2c   : > { %p612_p9 = scmp.lt.s32.totalorder %s431_s14, 3  ;;  %p613_p7 = scmp.ge.s32.totalorder %s431_s14, 1 }
  0x2e   : > { %p106_p0 = pnand %p613_p7, %p612_p9 }
  0x2f   : > { %s551_s25 = sand.u32 (!%p106_p0), 1, %s423_s12   ;;  %p614_p6 = scmp.ne.s32.totalorder (!%p106_p0), %s608_s21, 0 }
  0x30   : > { %109 = sbr.rel (%p106_p0) target bundleno = 455 (0x1c7), region = 24  ;;  %s274_s26 = sshll.u32 (!%p106_p0), %s551_s25, 3 }
  0x31   : > { %s112_s27 = scalar_lea.sflag (!%p106_p0), [#allocation5], %s551_s25  ;;  %s557_s28 = scalar_lea.vmem (!%p106_p0), [#allocation4], %s274_s26 }
  0x35   : > { %410 = dma.done.wait (%p614_p6), %s112_s27, 128  }
  0x36   : > { %412 = vsyncadd (%p614_p6), %s112_s27, 4294967168  ;;  %s276_s29 = sshll.u32 %s474_s0, 3  ;;  %v135_v0 = vlaneseq  ;;  %s143_s30 = sld [smem:[#allocation3]]  ;;  %v170_v27 = vld [vmem:[%s557_s28] sm:$0xff] }
  0x37   : > { %v139_v1 = vstv %s276_s29  ;;  %s282_s21 = sshll.u32 %s474_s0, 7  ;;  %s133_s4 = scalar_lea.vmem [#allocation7], %s274_s26 }
  0x38   : > { %v136_v2 = vshrl.u32 %v135_v0, 7  ;;  %v138_v3 = vand.u32 127, %v135_v0  ;;  %s198_s5 = sshll.u32 %s133_s4, 4  ;;  %s196_s8 = scalar_lea.hbm %s604_s2, %s282_s21  ;;  %s199_s5 = int_to_ptr.vmem [resolvable:$true] %s198_s5 }
  0x39   : > { %s185_s9 = scalar_lea.sflag [#allocation6], %s551_s25  ;;  %s367_s10 = scalar_lea.vmem %s199_s5, 128 }
  0x3a   : > { %v140_v4 = vadd.s32 %v139_v1, %v136_v2  ;;  %p368_p11 = scmp.ne.s32.totalorder %s199_s5, %s367_s10  ;;  %p615_p12 = scmp.ne.s32.totalorder %s609_s22, 0 }
  0x3b   : > { %s434_s15 = smov [#allocation7]  }
  0x3c   : > { %v141_v5 = vmul.u32 128, %v140_v4  ;;  %s144_s3 = smul.u32 2654435769, %s143_s30  ;;  %p369_p13 = pnand %p368_p11, %p615_p12 }
  0x3d   : > { %s371_s17 = sshll.u32 %s434_s15, 4  ;;  %s372_s17 = int_to_ptr.vmem [resolvable:$false] %s371_s17 }
  0x3e   : > { %v142_v6 = vadd.s32 %v141_v5, %v138_v3  ;;  %v145_v7 = vstv %s144_s3  ;;  %p370_p1 = pneg %p369_p13  ;;  %s373_s0 = scalar_lea.vmem %s372_s17, 256 }
  0x3f   : > { %p374_p3 = scmp.lt.s32.totalorder %s199_s5, %s372_s17  ;;  %p375_p5 = scmp.lt.s32.totalorder %s373_s0, %s367_s10 }
  0x40   : > { %v146_v8 = vadd.s32 %v145_v7, %v142_v6 }
  0x41   : > { %p376_p8 = por %p375_p5, %p374_p3 }
  0x42   : > { %v277_v9 = vshrl.u32 %v146_v8, 16 }
  0x43   : > { %p377_p10 = pnand %p376_p8, %p370_p1 }
  0x44   : > { %v149_v10 = vxor.u32 %v277_v9, %v146_v8 }
  0x46   : > { %v150_v11 = vmul.u32 2146121005, %v149_v10 }
  0x48   : > { %v278_v12 = vshrl.u32 %v150_v11, 15 }
  0x4a   : > { %v153_v13 = vxor.u32 %v278_v12, %v150_v11 }
  0x4c   : > { %v154_v14 = vmul.u32 2221598347, %v153_v13 }
  0x4e   : > { %v279_v15 = vshrl.u32 %v154_v14, 16 }
  0x50   : > { %v157_v16 = vxor.u32 %v279_v15, %v154_v14 }
  0x52   : > { %v280_v17 = vshrl.u32 %v157_v16, 9 }
  0x54   : > { %v160_v18 = vcvt.s32.f32 %v280_v17 }
  0x56   : > { %v161_v19 = vmul.f32 1.1920929e-07, %v160_v18 }
  0x58   : > { %v162_v20 = vadd.f32 1e-10, %v161_v19 }
  0x5a   : > { %331 = vlog2.f32 %v162_v20 }
  0x67   : > { %v332_v21 = vpop.eup %331 }
  0x68   : > { %v164_v22 = vmul.f32 0.6931472, %v332_v21 }
  0x6a   : > { %v165_v23 = vsub.f32 0.0, %v164_v22 }
  0x6c   : > { %v166_v24 = vadd.f32 1e-10, %v165_v23 }
  0x6e   : > { %333 = vlog2.f32 %v166_v24 }
  0x7b   : > { %v334_v25 = vpop.eup %333 }
  0x7c   : > { %v168_v26 = vmul.f32 0.6931472, %v334_v25 }
  0x7e   : > { %v169_v28 = vsub.f32 0.0, %v168_v26 }
  0x80   : > { %v171_v29 = vadd.f32 %v170_v27, %v169_v28 }
  0x82   : > { %v172_v30 = vmul.f32 1.25, %v171_v29 }
  0x84   : > { %173 = vmax.xlane.f32.xlu0 %v172_v30 }
 0x10d   : > { %v174_v31 = vpop.xlane.xlu0 %173 }
 0x10e   : > { %v175_v32 = vsub.f32 %v172_v30, %v174_v31 }
 0x110   : > { %v176_v33 = vmul.f32 1.442695, %v175_v32 }
 0x112   : > { %335 = vpow2.f32 %v176_v33 }
 0x11f   : > { %v336_v34 = vpop.eup %335 }
 0x120   : > { %178 = vadd.xlane.f32.xlu0 %v336_v34 }
 0x1a9   : > { %v179_v35 = vpop.xlane.xlu0 %178 }
 0x1aa   : > { %337 = vrcp.f32 %v179_v35 }
 0x1b7   : > { %v338_v36 = vpop.eup %337 }
 0x1b8   : > { %v182_v37 = vmul.f32 %v338_v36, %v336_v34 }
 0x1ba   : > { %183 = vst [vmem:[%s133_s4] sm:$0xff] %v182_v37 }
 0x1bb   : > { %380 = shalt.err (!%p377_p10)
}
 0x1bc   : > { %s381_s18 = scalar_lea.hbm %s196_s8, 128  ;;  %s385_s25 = scalar_lea.hbm %s604_s2, 256 }
 0x1bd   : > { %p382_p2 = scmp.ne.s32.totalorder %s196_s8, %s381_s18  ;;  %p386_p7 = scmp.lt.s32.totalorder %s196_s8, %s604_s2 }
 0x1be   : > { %p387_p0 = scmp.lt.s32.totalorder %s385_s25, %s381_s18 }
 0x1bf   : > { %p383_p4 = pnand %p382_p2, %p615_p12 }
 0x1c0   : > { %p388_p6 = por %p387_p0, %p386_p7 }
 0x1c1   : > { %p384_p9 = pneg %p383_p4 }
 0x1c3   : > { %p389_p11 = pnand %p388_p6, %p384_p9 }
 0x1c5   : > { %392 = shalt.err (!%p389_p11)
}
 0x1c6   : > { %287 = dma.vmem_to_hbm [thread:$0]  (%p615_p12), %s199_s5, 128, %s196_s8, %s185_s9  }
 0x1c7 PF: > { %s210_s28 = sand.u32 1, %s419_s11   ;;  %p616_p13 = scmp.ne.s32.totalorder %s610_s23, 0 }
 0x1c8   : > { %p617_p1 = scmp.ge.s32.totalorder %s431_s14, 2  ;;  %s211_s29 = scalar_lea.sflag [#allocation6], %s210_s28 }
 0x1ca   : > { %p294_p3 = pnand %p617_p1, %p616_p13 }
 0x1cc   : > { %p295_p5 = pneg %p294_p3 }
 0x1ce   : > { %414 = dma.done.wait (%p295_p5), %s211_s29, 128  }
 0x1cf   : > { %416 = vsyncadd (%p295_p5), %s211_s29, 4294967168  ;;  %p16_p8 = scmp.ge.s32.totalorder %s478_s16, 4   ;;  %s618_s11 = smov %s423_s12 }
 0x1d0   : > { %s619_s12 = smov %s427_s13  ;;  %s620_s13 = smov %s490_s19 }
 0x1d1   : > { %s621_s14 = smov %s478_s16  ;;  %18 = sbr.rel (!%p16_p8) target bundleno = 7 (0x7), region = 69 }
 0x1d6   :  { %216 = vsyncpa [#allocation5], 1 }
 0x1d7   :  { %218 = vsyncpa [#allocation5 + $0x1], 1 }
 0x1d8   :  { %219 = vsyncpa [#allocation6], 1 }
 0x1d9   :  { %221 = vsyncpa [#allocation6 + $0x1], 1 }

</bundles_post_ra>
